<compile_context>
chip_gen: v6e
topology: v6e:2x2x1
jax: 0.10.0
libtpu: 0.0.40
codegen_flags: <defaults>
</compile_context>

<pallas_src>
import jax
import jax.numpy as jnp
from jax.experimental import pallas as pl
from jax.experimental.pallas import tpu as pltpu


def _round_up(a, b):
    return (a + b - 1) // b * b


# ---------------- softplus prepass on the transposed weight ----------------
def _softplus_kernel(w_ref, o_ref):
    w = w_ref[...].astype(jnp.float32)
    # One-exp numerically stable softplus: max(w, 0) + log1p(exp(-|w|)).
    sp = jnp.maximum(w, 0.0) + jnp.log1p(jnp.exp(-jnp.abs(w)))
    o_ref[...] = sp.astype(o_ref.dtype)


def _softplus_bf16(w_t, tk, tn):
    """Elementwise softplus of the [K, N] weight, emitted as bf16 MXU operand."""
    Kp, Np = w_t.shape
    return pl.pallas_call(
        _softplus_kernel,
        out_shape=jax.ShapeDtypeStruct((Kp, Np), jnp.bfloat16),
        grid_spec=pltpu.PrefetchScalarGridSpec(
            num_scalar_prefetch=0,
            grid=(Kp // tk, Np // tn),
            in_specs=[pl.BlockSpec((tk, tn), lambda i, j: (i, j))],
            out_specs=pl.BlockSpec((tk, tn), lambda i, j: (i, j)),
        ),
        compiler_params=pltpu.CompilerParams(
            dimension_semantics=("parallel", "parallel"),
            vmem_limit_bytes=32 * 1024 * 1024,
        ),
        cost_estimate=pl.CostEstimate(
            flops=3 * Kp * Np,
            transcendentals=2 * Kp * Np,
            bytes_accessed=Kp * Np * (4 + 2),
        ),
    )(w_t)


# ---------------- tiled matmul: y = x @ softplus(W).T ----------------
def _matmul_kernel(x_ref, wt_ref, o_ref, acc_ref):
    @pl.when(pl.program_id(2) == 0)
    def _():
        acc_ref[...] = jnp.zeros_like(acc_ref)

    # bf16 MXU operands, f32 accumulation. RHS is already [K, N]: no transpose.
    acc_ref[...] += jnp.dot(
        x_ref[...].astype(jnp.bfloat16),
        wt_ref[...],
        preferred_element_type=jnp.float32,
    )

    @pl.when(pl.program_id(2) == pl.num_programs(2) - 1)
    def _():
        o_ref[...] = acc_ref[...].astype(o_ref.dtype)


def positive_linear(x, weight, *, tm=256, tn=512, tk=512):
    """PositiveLinear forward: y = x @ softplus(weight).T.

    x: (B, in_features) f32; weight: (out_features, in_features) f32.
    """
    B, K = x.shape
    N, Kw = weight.shape
    assert K == Kw, (K, Kw)

    # Hardware-aligned tile sizes (sublane 8 / lane 128), shrunk for small shapes.
    tm = min(tm, _round_up(B, 8))
    tn = min(tn, _round_up(N, 128))
    tk = min(tk, _round_up(K, 128))

    Mp = _round_up(B, tm)
    Np = _round_up(N, tn)
    Kp = _round_up(K, tk)

    # Wrapper-side layout plumbing: pad to tile multiples and present the
    # weight as a [K, N] RHS slab (lane-dense output along out_features).
    x_p = jnp.pad(x, ((0, Mp - B), (0, Kp - K)))
    w_t = jnp.pad(weight.T, ((0, Kp - K), (0, Np - N)))

    # softplus(W)^T computed exactly once (not once per batch tile).
    w_pos_t = _softplus_bf16(w_t, tk, tn)

    out = pl.pallas_call(
        _matmul_kernel,
        out_shape=jax.ShapeDtypeStruct((Mp, Np), x.dtype),
        grid_spec=pltpu.PrefetchScalarGridSpec(
            num_scalar_prefetch=0,
            grid=(Mp // tm, Np // tn, Kp // tk),
            in_specs=[
                pl.BlockSpec((tm, tk), lambda i, j, k: (i, k)),
                pl.BlockSpec((tk, tn), lambda i, j, k: (k, j)),
            ],
            out_specs=pl.BlockSpec((tm, tn), lambda i, j, k: (i, j)),
            scratch_shapes=[pltpu.VMEM((tm, tn), jnp.float32)],
        ),
        compiler_params=pltpu.CompilerParams(
            dimension_semantics=("parallel", "parallel", "arbitrary"),
            vmem_limit_bytes=32 * 1024 * 1024,
        ),
        cost_estimate=pl.CostEstimate(
            flops=2 * Mp * Np * Kp,
            transcendentals=0,
            bytes_accessed=Mp * Kp * 4 + Kp * Np * 2 + Mp * Np * 4,
        ),
    )(x_p, w_pos_t)

    return out[:B, :N]


def _xavier_uniform(key, out_features, in_features):
    # torch.nn.init.xavier_uniform_: U(-a, a), a = sqrt(6 / (fan_in + fan_out))
    bound = jnp.sqrt(6.0 / (in_features + out_features))
    return jax.random.uniform(
        key, (out_features, in_features), dtype=jnp.float32,
        minval=-bound, maxval=bound,
    )


if __name__ == "__main__":
    key = jax.random.PRNGKey(0)
    k_x, k_w = jax.random.split(key)

    batch = 8
    in_features = 32
    out_features = 16

    x = jax.random.normal(k_x, (batch, in_features), dtype=jnp.float32)
    weight = _xavier_uniform(k_w, out_features, in_features)

    y = jax.block_until_ready(positive_linear(x, weight))

    # Pure-JAX reference check (f32). bf16 MXU operands with f32 accumulation
    # -> loosened tolerance.
    y_ref = x @ jax.nn.softplus(weight).T
    assert y.shape == (batch, out_features)
    assert jnp.allclose(y, y_ref, atol=2e-2, rtol=2e-2), "mismatch vs reference"

    print("KERNEL_OK")
</pallas_src>

<mosaic_0001>
module attributes {stable_mosaic.version = 11 : i64} {
  func.func @_softplus_kernel(%arg0: i32, %arg1: i32, %arg2: memref<128x128xf32, #tpu.memory_space<vmem>>, %arg3: memref<128x128xbf16, #tpu.memory_space<vmem>>) attributes {dimension_semantics = [#tpu.dimension_semantics<parallel>, #tpu.dimension_semantics<parallel>], iteration_bounds = array<i64: 1, 1>, scalar_prefetch = 0 : i64, scratch_operands = 0 : i64, tpu.core_type = #tpu.core_type<tc>, window_params = [{transform_indices = @transform_0, window_bounds = array<i64: 128, 128>}, {transform_indices = @transform_1, window_bounds = array<i64: 128, 128>}]} {
    %c0 = arith.constant 0 : index
    %c0_0 = arith.constant 0 : index
    %0 = vector.load %arg2[%c0, %c0_0] : memref<128x128xf32, #tpu.memory_space<vmem>>, vector<128x128xf32>
    %cst = arith.constant 0.000000e+00 : f32
    %1 = vector.broadcast %cst : f32 to vector<128x128xf32>
    %2 = arith.maximumf %0, %1 : vector<128x128xf32>
    %3 = math.absf %0 : vector<128x128xf32>
    %cst_1 = arith.constant 0.000000e+00 : f32
    %4 = vector.broadcast %cst_1 : f32 to vector<128x128xf32>
    %5 = arith.subf %4, %3 : vector<128x128xf32>
    %6 = math.exp %5 : vector<128x128xf32>
    %7 = math.log1p %6 : vector<128x128xf32>
    %8 = arith.addf %2, %7 : vector<128x128xf32>
    %9 = arith.truncf %8 : vector<128x128xf32> to vector<128x128xbf16>
    %c0_2 = arith.constant 0 : index
    %c0_3 = arith.constant 0 : index
    %10 = vector.load %arg3[%c0_2, %c0_3] : memref<128x128xbf16, #tpu.memory_space<vmem>>, vector<128x128xbf16>
    tpu.vector_store %arg3[%c0_2, %c0_3], %9 {strides = array<i32>} : memref<128x128xbf16, #tpu.memory_space<vmem>>, vector<128x128xbf16>,
    return
  }
  func.func @transform_0(%arg0: i32, %arg1: i32) -> (i32, i32) {
    %c0_i32 = arith.constant 0 : i32
    return %arg0, %arg1 : i32, i32
  }
  func.func @transform_1(%arg0: i32, %arg1: i32) -> (i32, i32) {
    %c0_i32 = arith.constant 0 : i32
    return %arg0, %arg1 : i32, i32
  }
}

</mosaic_0001>

<bundles_post_ra>
// kernel: tpu_custom_call.1
= control target key start
LH: loop header
LB: loop body
LE: loop exit
PB: predicated region body
PF: predicated region fallthrough
CT: control target
= control target key end

     0   :  { %6 = vsyncpa [#allocation3], 0  ;;  %s789_s0 = inlined_call_operand.hbm [shape: f32[128,128], index: 0, kind: input, shape index: {}]   ;;  %s790_s1 = inlined_call_operand.hbm [shape: bf16[128,128], index: 1, kind: output, shape index: {}]  }
   0x1   :  { %7 = vsyncpa [#allocation4], 0  ;;  %s569_s6 = smov [#allocation2]  }
   0x2   :  { %s13_s7 = sshll.u32 %s569_s6, 4  ;;  %s14_s7 = int_to_ptr.vmem [resolvable:$true] %s13_s7 }
   0x3   :  { %s533_s8 = scalar_lea.vmem %s14_s7, 2048  ;;  %p538_p1 = scmp.lt.s32.totalorder %s14_s7, %s14_s7 }
   0x4   :  { %p534_p0 = scmp.ne.s32.totalorder %s14_s7, %s533_s8  ;;  %p539_p2 = scmp.lt.s32.totalorder %s533_s8, %s533_s8 }
   0x6   :  { %p540_p3 = por %p539_p2, %p538_p1 }
   0x8   :  { %p541_p4 = pnand %p540_p3, %p534_p0 }
   0xa   :  { %544 = shalt.err (!%p541_p4)
}
   0xb   :  { %s570_s9 = smov 128   ;;  %s571_s10 = smov 8  }
   0xc   :  { %19 = dma.hbm_to_vmem [thread:$0]  %s789_s0, 2048, %s14_s7, [#allocation3], %s570_s9, %s570_s9, %s571_s10  }
   0xd   :  { %565 = dma.done.wait [#allocation3], 2048  }
   0xe   :  { %566 = vsyncadd [#allocation3], 4294965248  ;;  %v588_v0 = vld [vmem:[#allocation2] sm:$0xff]  ;;  %v590_v1 = vld [vmem:[#allocation2 + $0x8] sm:$0xff]  ;;  %s572_s0 = smov [#allocation5]  }
   0xf   :  { %v592_v2 = vld [vmem:[#allocation2 + $0x10] sm:$0xff]  ;;  %v55_v3 = vand.u32 2147483647, %v588_v0  ;;  %v56_v4 = vand.u32 2147483647, %v590_v1  ;;  %v596_v5 = vld [vmem:[#allocation2 + $0x18] sm:$0xff] }
  0x10   :  { %v57_v6 = vand.u32 2147483647, %v592_v2  ;;  %v599_v7 = vld [vmem:[#allocation2 + $0x20] sm:$0xff]  ;;  %v58_v10 = vand.u32 2147483647, %v596_v5  ;;  %v602_v11 = vld [vmem:[#allocation2 + $0x28] sm:$0xff] }
  0x11   :  { %v71_v8 = vsub.f32 0.0, %v55_v3  ;;  %v72_v9 = vsub.f32 0.0, %v56_v4  ;;  %v59_v13 = vand.u32 2147483647, %v599_v7  ;;  %v605_v14 = vld [vmem:[#allocation2 + $0x30] sm:$0xff]  ;;  %v607_v15 = vld [vmem:[#allocation2 + $0x38] sm:$0xff] }
  0x12   :  { %v73_v12 = vsub.f32 0.0, %v57_v6  ;;  %v74_v18 = vsub.f32 0.0, %v58_v10  ;;  %v60_v20 = vand.u32 2147483647, %v602_v11  ;;  %v61_v23 = vand.u32 2147483647, %v605_v14 }
  0x13   :  { %v87_v16 = vmul.f32 1.442695, %v71_v8  ;;  %v89_v17 = vmul.f32 1.442695, %v72_v9  ;;  %v75_v21 = vsub.f32 0.0, %v59_v13  ;;  %v612_v27 = vld [vmem:[#allocation2 + $0x40] sm:$0xff] }
  0x14   :  { %v91_v19 = vmul.f32 1.442695, %v73_v12  ;;  %v93_v22 = vmul.f32 1.442695, %v74_v18  ;;  %v62_v24 = vand.u32 2147483647, %v607_v15 }
  0x15   :  { %461 = vpow2.f32 %v87_v16  ;;  %v76_v25 = vsub.f32 0.0, %v60_v20  ;;  %v95_v26 = vmul.f32 1.442695, %v75_v21  ;;  %v614_v28 = vld [vmem:[#allocation2 + $0x48] sm:$0xff]  ;;  %v77_v29 = vsub.f32 0.0, %v61_v23  ;;  %v617_v33 = vld [vmem:[#allocation2 + $0x50] sm:$0xff] }
  0x16   :  { %463 = vpow2.f32 %v89_v17  ;;  %v78_v30 = vsub.f32 0.0, %v62_v24  ;;  %v63_v32 = vand.u32 2147483647, %v612_v27  ;;  %v619_v34 = vld [vmem:[#allocation2 + $0x58] sm:$0xff]  ;;  %v64_v36 = vand.u32 2147483647, %v614_v28 }
  0x17   :  { %465 = vpow2.f32 %v91_v19  ;;  %v97_v31 = vmul.f32 1.442695, %v76_v25  ;;  %v99_v35 = vmul.f32 1.442695, %v77_v29  ;;  %v622_v39 = vld [vmem:[#allocation2 + $0x60] sm:$0xff]  ;;  %v626_v43 = vld [vmem:[#allocation2 + $0x68] sm:$0xff] }
  0x18   :  { %467 = vpow2.f32 %v93_v22  ;;  %v101_v37 = vmul.f32 1.442695, %v78_v30  ;;  %v79_v38 = vsub.f32 0.0, %v63_v32  ;;  %v80_v40 = vsub.f32 0.0, %v64_v36  ;;  %v631_v54 = vld [vmem:[#allocation2 + $0x70] sm:$0xff]  ;;  %v639_v63 = vld [vmem:[#allocation2 + $0x78] sm:$0xff] }
  0x19   :  { %469 = vpow2.f32 %v95_v26  ;;  %v65_v41 = vand.u32 2147483647, %v617_v33  ;;  %v66_v42 = vand.u32 2147483647, %v619_v34  ;;  %v67_v47 = vand.u32 2147483647, %v622_v39 }
  0x1a   :  { %471 = vpow2.f32 %v97_v31  ;;  %v103_v44 = vmul.f32 1.442695, %v79_v38  ;;  %v105_v48 = vmul.f32 1.442695, %v80_v40  ;;  %v68_v49 = vand.u32 2147483647, %v626_v43 }
  0x1b   :  { %473 = vpow2.f32 %v99_v35  ;;  %v81_v45 = vsub.f32 0.0, %v65_v41  ;;  %v82_v46 = vsub.f32 0.0, %v66_v42  ;;  %v39_v51 = vmax.f32 %v588_v0, 0.0  ;;  %s364_s13 = sshll.u32 %s572_s0, 4  ;;  %s365_s13 = int_to_ptr.vmem [resolvable:$true] %s364_s13 }
  0x1c   :  { %475 = vpow2.f32 %v101_v37  ;;  %v83_v53 = vsub.f32 0.0, %v67_v47  ;;  %v40_v55 = vmax.f32 %v590_v1, 0.0  ;;  %v41_v56 = vmax.f32 %v592_v2, 0.0  ;;  %s545_s14 = scalar_lea.vmem %s365_s13, 1024  ;;  %p550_p6 = scmp.lt.s32.totalorder %s365_s13, %s365_s13 }
  0x1d   :  { %v107_v50 = vmul.f32 1.442695, %v81_v45  ;;  %477 = vpow2.f32 %v103_v44  ;;  %v109_v52 = vmul.f32 1.442695, %v82_v46  ;;  %v42_v57 = vmax.f32 %v596_v5, 0.0  ;;  %p546_p5 = scmp.ne.s32.totalorder %s365_s13, %s545_s14  ;;  %p551_p7 = scmp.lt.s32.totalorder %s545_s14, %s545_s14 }
  0x1e   :  { %v43_v58 = vmax.f32 %v599_v7, 0.0  ;;  %v44_v60 = vmax.f32 %v602_v11, 0.0  ;;  %v45_v61 = vmax.f32 %v605_v14, 0.0  ;;  %479 = vpow2.f32 %v105_v48 }
  0x1f   :  { %v84_v62 = vsub.f32 0.0, %v68_v49  ;;  %v46_v6 = vmax.f32 %v607_v15, 0.0  ;;  %481 = vpow2.f32 %v107_v50  ;;  %v69_v8 = vand.u32 2147483647, %v631_v54  ;;  %p552_p8 = por %p551_p7, %p550_p6 }
  0x20   :  { %483 = vpow2.f32 %v109_v52  ;;  %v111_v13 = vmul.f32 1.442695, %v83_v53  ;;  %v47_v18 = vmax.f32 %v612_v27, 0.0  ;;  %v70_v19 = vand.u32 2147483647, %v639_v63 }
  0x21   :  { %v113_v23 = vmul.f32 1.442695, %v84_v62  ;;  %v48_v26 = vmax.f32 %v614_v28, 0.0  ;;  %v646_v32 = vsub.f32 0.0, %v69_v8  ;;  %p553_p9 = pnand %p552_p8, %p546_p5 }
  0x22   :  { %v462_v59 = vpop.eup %461  ;;  %v648_v38 = vsub.f32 0.0, %v70_v19 }
  0x23   :  { %v464_v3 = vpop.eup %463  ;;  %v119_v4 = vadd.f32 1.0, %v462_v59  ;;  %v122_v10 = vmul.f32 -0.5, %v462_v59  ;;  %v125_v21 = vand.u32 2147483647, %v462_v59  ;;  %v115_v15 = vmul.f32 1.442695, %v646_v32 }
  0x24   :  { %v466_v9 = vpop.eup %465  ;;  %v128_v12 = vadd.f32 1.0, %v464_v3  ;;  %v131_v22 = vmul.f32 -0.5, %v464_v3  ;;  %v134_v24 = vand.u32 2147483647, %v464_v3  ;;  %v50_v32 = vmax.f32 %v619_v34, 0.0 }
  0x25   :  { %v468_v16 = vpop.eup %467  ;;  %485 = vlog2.f32 %v119_v4  ;;  %v137_v17 = vadd.f32 1.0, %v466_v9  ;;  %v123_v30 = vadd.f32 1.0, %v122_v10  ;;  %v140_v31 = vmul.f32 -0.5, %v466_v9 }
  0x26   :  { %v470_v20 = vpop.eup %469  ;;  %487 = vlog2.f32 %v128_v12  ;;  %v146_v25 = vadd.f32 1.0, %v468_v16  ;;  %v149_v36 = vmul.f32 -0.5, %v468_v16  ;;  %vm650_vm0 = vcmp.lt.f32.partialorder %v125_v21, 0.0004427343 }
  0x27   :  { %489 = vlog2.f32 %v137_v17  ;;  %v472_v29 = vpop.eup %471  ;;  %v155_v37 = vadd.f32 1.0, %v470_v20  ;;  %v132_v41 = vadd.f32 1.0, %v131_v22  ;;  %v158_v42 = vmul.f32 -0.5, %v470_v20 }
  0x28   :  { %491 = vpow2.f32 %v111_v13  ;;  %v474_v35 = vpop.eup %473  ;;  %vm656_vm1 = vcmp.lt.f32.partialorder %v134_v24, 0.0004427343  ;;  %v143_v46 = vand.u32 2147483647, %v466_v9  ;;  %v164_v47 = vadd.f32 1.0, %v472_v29 }
  0x29   :  { %493 = vlog2.f32 %v146_v25  ;;  %v654_v44 = vpop.eup %475  ;;  %v167_v48 = vmul.f32 -0.5, %v472_v29  ;;  %v124_v49 = vmul.f32 %v462_v59, %v123_v30  ;;  %v141_v50 = vadd.f32 1.0, %v140_v31 }
  0x2a   :  { %495 = vpow2.f32 %v113_v23  ;;  %v152_v52 = vand.u32 2147483647, %v468_v16  ;;  %v173_v53 = vadd.f32 1.0, %v474_v35  ;;  %v660_v62 = vpop.eup %477  ;;  %v150_v4 = vadd.f32 1.0, %v149_v36 }
  0x2b   :  { %497 = vlog2.f32 %v155_v37  ;;  %v161_v8 = vand.u32 2147483647, %v470_v20  ;;  %v176_v10 = vmul.f32 -0.5, %v474_v35  ;;  %v159_v12 = vadd.f32 1.0, %v158_v42  ;;  %v663_v19 = vpop.eup %479 }
  0x2c   :  { %499 = vlog2.f32 %v164_v47  ;;  %v170_v13 = vand.u32 2147483647, %v472_v29  ;;  %v182_v17 = vadd.f32 1.0, %v654_v44  ;;  %v133_v21 = vmul.f32 %v464_v3, %v132_v41  ;;  %v669_v24 = vpop.eup %481 }
  0x2d   :  { %501 = vlog2.f32 %v173_v53  ;;  %vm665_vm2 = vcmp.lt.f32.partialorder %v143_v46, 0.0004427343  ;;  %v168_v59 = vadd.f32 1.0, %v167_v48  ;;  %v179_v23 = vand.u32 2147483647, %v474_v35  ;;  %v672_v36 = vpop.eup %483 }
  0x2e   :  { %v142_v25 = vmul.f32 %v466_v9, %v141_v50  ;;  %v177_v30 = vadd.f32 1.0, %v176_v10  ;;  %503 = vlog2.f32 %v182_v17  ;;  %v191_v31 = vadd.f32 1.0, %v660_v62 }
  0x2f   :  { %v151_v37 = vmul.f32 %v468_v16, %v150_v4  ;;  %vm674_vm3 = vcmp.lt.f32.partialorder %v152_v52, 0.0004427343  ;;  %vm678_vm4 = vcmp.lt.f32.partialorder %v161_v8, 0.0004427343  ;;  %v185_v41 = vmul.f32 -0.5, %v654_v44 }
  0x30   :  { %v160_v47 = vmul.f32 %v470_v20, %v159_v12  ;;  %vm683_vm5 = vcmp.lt.f32.partialorder %v170_v13, 0.0004427343  ;;  %505 = vlog2.f32 %v191_v31  ;;  %v200_v48 = vadd.f32 1.0, %v663_v19 }
  0x31   :  { %v169_v52 = vmul.f32 %v472_v29, %v168_v59  ;;  %vm688_vm6 = vcmp.lt.f32.partialorder %v179_v23, 0.0004427343  ;;  %v188_v4 = vand.u32 2147483647, %v654_v44  ;;  %v178_v17 = vmul.f32 %v474_v35, %v177_v30 }
  0x32   :  { %v486_v46 = vpop.eup %485  ;;  %v194_v20 = vmul.f32 -0.5, %v660_v62  ;;  %507 = vlog2.f32 %v200_v48  ;;  %v209_v29 = vadd.f32 1.0, %v669_v24  ;;  %v197_v35 = vand.u32 2147483647, %v660_v62 }
  0x33   :  { %v488_v16 = vpop.eup %487  ;;  %v121_v50 = vmul.f32 0.6931472, %v486_v46  ;;  %v186_v46 = vadd.f32 1.0, %v185_v41  ;;  %v203_v30 = vmul.f32 -0.5, %v663_v19  ;;  %vm713_vm7 = vcmp.lt.f32.partialorder %v188_v4, 0.0004427343 }
  0x34   :  { %v490_v8 = vpop.eup %489  ;;  %v130_v10 = vmul.f32 0.6931472, %v488_v16  ;;  %509 = vlog2.f32 %v209_v29  ;;  %v212_v22 = vmul.f32 -0.5, %v669_v24  ;;  %vm724_vm8 = vcmp.lt.f32.partialorder %v197_v35, 0.0004427343 }
  0x35   :  { %v694_v12 = vpop.eup %491  ;;  %v127_v13 = vsel %vm650_vm0, %v124_v49, %v121_v50  ;;  %v139_v31 = vmul.f32 0.6931472, %v490_v8  ;;  %v187_v2 = vmul.f32 %v654_v44, %v186_v46  ;;  %v221_v3 = vmul.f32 -0.5, %v672_v36 }
  0x36   :  { %v494_v59 = vpop.eup %493  ;;  %v136_v23 = vsel %vm656_vm1, %v133_v21, %v130_v10  ;;  %v263_v16 = vadd.f32 %v127_v13, %v39_v51  ;;  %v195_v51 = vadd.f32 1.0, %v194_v20  ;;  %v218_v21 = vadd.f32 1.0, %v672_v36 }
  0x37   :  { %v705_v48 = vpop.eup %495  ;;  %v264_v40 = vadd.f32 %v136_v23, %v40_v55  ;;  %v145_v49 = vsel %vm665_vm2, %v142_v25, %v139_v31  ;;  %v148_v41 = vmul.f32 0.6931472, %v494_v59  ;;  %v204_v20 = vadd.f32 1.0, %v203_v30 }
  0x38   :  { %v498_v50 = vpop.eup %497  ;;  %v265_v45 = vadd.f32 %v145_v49, %v41_v56  ;;  %511 = vlog2.f32 %v218_v21  ;;  %v206_v13 = vand.u32 2147483647, %v663_v19  ;;  %v227_v44 = vadd.f32 1.0, %v694_v12 }
  0x39   :  { %v411_v8 = vpack.c.bf16 %v264_v40, %v263_v16  ;;  %v154_v1 = vsel %vm674_vm3, %v151_v37, %v148_v41  ;;  %v157_v55 = vmul.f32 0.6931472, %v498_v50  ;;  %v500_v25 = vpop.eup %499  ;;  %v196_v59 = vmul.f32 %v660_v62, %v195_v51 }
  0x3a   :  { %v266_v10 = vadd.f32 %v154_v1, %v42_v57  ;;  %v502_v4 = vpop.eup %501  ;;  %v166_v37 = vmul.f32 0.6931472, %v500_v25  ;;  %v213_v23 = vadd.f32 1.0, %v212_v22  ;;  %513 = vlog2.f32 %v227_v44 }
  0x3b   :  { %412 = vst [vmem:[#allocation5] sm:$0xff] %v411_v8   ;;  %v163_v42 = vsel %vm678_vm4, %v160_v47, %v157_v55  ;;  %v175_v57 = vmul.f32 0.6931472, %v502_v4  ;;  %v504_v46 = vpop.eup %503  ;;  %v205_v9 = vmul.f32 %v663_v19, %v204_v20  ;;  %vm745_vm9 = vcmp.lt.f32.partialorder %v206_v13, 0.0004427343 }
  0x3c   :  { %v416_v31 = vpack.c.bf16 %v266_v10, %v265_v45  ;;  %v267_v5 = vadd.f32 %v163_v42, %v43_v58  ;;  %v172_v29 = vsel %vm683_vm5, %v169_v52, %v166_v37  ;;  %v184_v58 = vmul.f32 0.6931472, %v504_v46 }
  0x3d   :  { %v268_v47 = vadd.f32 %v172_v29, %v44_v60  ;;  %v181_v7 = vsel %vm688_vm6, %v178_v17, %v175_v57  ;;  %v506_v16 = vpop.eup %505  ;;  %v236_v52 = vadd.f32 1.0, %v705_v48  ;;  %v215_v53 = vand.u32 2147483647, %v669_v24 }
  0x3e   :  { %448 = vst [vmem:[#allocation5 + $0x8] sm:$0xff] %v416_v31   ;;  %v269_v35 = vadd.f32 %v181_v7, %v45_v61  ;;  %v190_v11 = vsel %vm713_vm7, %v187_v2, %v184_v58  ;;  %v193_v60 = vmul.f32 0.6931472, %v506_v16  ;;  %v214_v61 = vmul.f32 %v669_v24, %v213_v23 }
  0x3f   :  { %v421_v30 = vpack.c.bf16 %v268_v47, %v267_v5  ;;  %v508_v17 = vpop.eup %507  ;;  %v270_v14 = vadd.f32 %v190_v11, %v46_v6  ;;  %v222_v19 = vadd.f32 1.0, %v221_v3  ;;  %515 = vlog2.f32 %v236_v52 }
  0x40   :  { %v199_v40 = vsel %vm724_vm8, %v196_v59, %v193_v60  ;;  %v202_v49 = vmul.f32 0.6931472, %v508_v17  ;;  %v224_v41 = vand.u32 2147483647, %v672_v36  ;;  %v230_v50 = vmul.f32 -0.5, %v694_v12 }
  0x41   :  { %449 = vst [vmem:[#allocation5 + $0x10] sm:$0xff] %v421_v30   ;;  %v426_v45 = vpack.c.bf16 %v270_v14, %v269_v35  ;;  %v271_v0 = vadd.f32 %v199_v40, %v47_v18  ;;  %v117_v6 = vmul.f32 1.442695, %v648_v38  ;;  %v510_v24 = vpop.eup %509  ;;  %v49_v21 = vmax.f32 %v617_v33, 0.0 }
  0x42   :  { %v208_v51 = vsel %vm745_vm9, %v205_v9, %v202_v49  ;;  %vm767_vm10 = vcmp.lt.f32.partialorder %v215_v53, 0.0004427343  ;;  %v211_v27 = vmul.f32 0.6931472, %v510_v24  ;;  %v239_v18 = vmul.f32 -0.5, %v705_v48 }
  0x43   :  { %450 = vst [vmem:[#allocation5 + $0x18] sm:$0xff] %v426_v45   ;;  %v272_v1 = vadd.f32 %v208_v51, %v48_v26  ;;  %517 = vpow2.f32 %v115_v15  ;;  %v223_v38 = vmul.f32 %v672_v36, %v222_v19  ;;  %v231_v55 = vadd.f32 1.0, %v230_v50 }
  0x44   :  { %519 = vpow2.f32 %v117_v6  ;;  %v217_v25 = vsel %vm767_vm10, %v214_v61, %v211_v27  ;;  %vm225_vm11 = vcmp.lt.f32.partialorder %v224_v41, 0.0004427343  ;;  %v233_v10 = vand.u32 2147483647, %v694_v12 }
  0x45   :  { %v512_v22 = vpop.eup %511  ;;  %v431_v33 = vpack.c.bf16 %v272_v1, %v271_v0  ;;  %v273_v26 = vadd.f32 %v217_v25, %v49_v21  ;;  %v240_v2 = vadd.f32 1.0, %v239_v18  ;;  %v232_v4 = vmul.f32 %v694_v12, %v231_v55 }
  0x46   :  { %v220_v28 = vmul.f32 0.6931472, %v512_v22  ;;  %v242_v34 = vand.u32 2147483647, %v705_v48  ;;  %vm234_vm12 = vcmp.lt.f32.partialorder %v233_v10, 0.0004427343 }
  0x47   :  { %451 = vst [vmem:[#allocation5 + $0x20] sm:$0xff] %v431_v33   ;;  %v514_v36 = vpop.eup %513  ;;  %v51_v37 = vmax.f32 %v622_v39, 0.0  ;;  %v241_v31 = vmul.f32 %v705_v48, %v240_v2  ;;  %v52_v57 = vmax.f32 %v626_v43, 0.0  ;;  %v53_v30 = vmax.f32 %v631_v54, 0.0 }
  0x48   :  { %v226_v56 = vsel %vm225_vm11, %v223_v38, %v220_v28  ;;  %v229_v20 = vmul.f32 0.6931472, %v514_v36  ;;  %vm243_vm13 = vcmp.lt.f32.partialorder %v242_v34, 0.0004427343  ;;  %v54_v53 = vmax.f32 %v639_v63, 0.0 }
  0x49   :  { %v274_v42 = vadd.f32 %v226_v56, %v50_v32 }
  0x4a   :  { %v235_v44 = vsel %vm234_vm12, %v232_v4, %v229_v20 }
  0x4b   :  { %v436_v13 = vpack.c.bf16 %v274_v42, %v273_v26  ;;  %v275_v29 = vadd.f32 %v235_v44, %v51_v37 }
  0x4c   :  { %v516_v5 = vpop.eup %515 }
  0x4d   :  { %452 = vst [vmem:[#allocation5 + $0x28] sm:$0xff] %v436_v13   ;;  %v238_v46 = vmul.f32 0.6931472, %v516_v5 }
  0x4f   :  { %v244_v12 = vsel %vm243_vm13, %v241_v31, %v238_v46 }
  0x50   :  { %v518_v59 = vpop.eup %517  ;;  %v276_v23 = vadd.f32 %v244_v12, %v52_v57 }
  0x51   :  { %v520_v3 = vpop.eup %519  ;;  %v245_v47 = vadd.f32 1.0, %v518_v59  ;;  %v248_v39 = vmul.f32 -0.5, %v518_v59  ;;  %v251_v35 = vand.u32 2147483647, %v518_v59 }
  0x52   :  { %v441_v7 = vpack.c.bf16 %v276_v23, %v275_v29  ;;  %v254_v58 = vadd.f32 1.0, %v520_v3  ;;  %v257_v48 = vmul.f32 -0.5, %v520_v3  ;;  %v260_v9 = vand.u32 2147483647, %v520_v3 }
  0x53   :  { %521 = vlog2.f32 %v245_v47  ;;  %v249_v16 = vadd.f32 1.0, %v248_v39  ;;  %vm252_vm14 = vcmp.lt.f32.partialorder %v251_v35, 0.0004427343 }
  0x54   :  { %453 = vst [vmem:[#allocation5 + $0x30] sm:$0xff] %v441_v7   ;;  %523 = vlog2.f32 %v254_v58  ;;  %v258_v43 = vadd.f32 1.0, %v257_v48  ;;  %vm261_vm15 = vcmp.lt.f32.partialorder %v260_v9, 0.0004427343 }
  0x55   :  { %v250_v62 = vmul.f32 %v518_v59, %v249_v16 }
  0x56   :  { %v259_v11 = vmul.f32 %v520_v3, %v258_v43 }
  0x60   :  { %v522_v52 = vpop.eup %521 }
  0x61   :  { %v524_v60 = vpop.eup %523  ;;  %v247_v17 = vmul.f32 0.6931472, %v522_v52 }
  0x62   :  { %v256_v14 = vmul.f32 0.6931472, %v524_v60 }
  0x63   :  { %v253_v61 = vsel %vm252_vm14, %v250_v62, %v247_v17 }
  0x64   :  { %v262_v19 = vsel %vm261_vm15, %v259_v11, %v256_v14  ;;  %v277_v40 = vadd.f32 %v253_v61, %v53_v30 }
  0x65   :  { %v278_v49 = vadd.f32 %v262_v19, %v54_v53 }
  0x67   :  { %v446_v41 = vpack.c.bf16 %v278_v49, %v277_v40 }
  0x69   :  { %454 = vst [vmem:[#allocation5 + $0x38] sm:$0xff] %v446_v41  }
  0x6a   :  { %556 = shalt.err (!%p553_p9)
}
  0x6b   :  { %s573_s15 = smov 64   ;;  %s574_s16 = smov 4  }
  0x6c   :  { %370 = dma.vmem_to_hbm [thread:$0]  %s365_s13, 1024, %s790_s1, [#allocation4], %s573_s15, %s573_s15, %s574_s16  }
  0x6d   :  { %567 = dma.done.wait [#allocation4], 1024  }
  0x6e   :  { %568 = vsyncadd [#allocation4], 4294966272 }
  0x6f   :  { %374 = vsyncpa [#allocation3], 1 }
  0x70   :  { %375 = vsyncpa [#allocation4], 1 }

</bundles_post_ra>
